<compile_context>
chip_gen: v6e
topology: v6e:2x2x1
jax: 0.10.0
libtpu: 0.0.40
codegen_flags: <defaults>
</compile_context>

<pallas_src>
import functools

import jax
import jax.numpy as jnp
import numpy as np
from jax.experimental import pallas as pl
from jax.experimental.pallas import tpu as pltpu


def _round_up(x, m):
    return ((x + m - 1) // m) * m


def _select_tm(M):
    """Pick the M-tile size (multiple of 16, <= 256).

    Prefers (a) a tile that divides M exactly (no row padding -> no extra HBM
    copy of the patch tensor) and (b) at least two grid tiles so the
    'parallel' M axis can be sharded across both v7x TensorCores.
    Returns (tm, Mp) with Mp % tm == 0 and Mp >= M.
    """
    cap = 256
    if M <= 64:
        tm = _round_up(M, 16)
        return tm, tm
    hi = max(16, (min(cap, M // 2) // 16) * 16)
    for tm in range(hi, 15, -16):
        if M % tm == 0:
            return tm, M
    tm = cap if M >= 2 * cap else _round_up((M + 1) // 2, 16)
    return tm, _round_up(M, tm)


# ----------------------------------------------------------------------------
# Pallas kernel: (patches @ resident-weight) + bias + activation, one K step
# ----------------------------------------------------------------------------
def _gemm_bias_act_kernel(p_ref, w_ref, b_ref, o_ref, *, activation):
    # p_ref: [tm, Kp]     bf16 im2col patch tile (Kp % 128 == 0)
    # w_ref: [Kp, Coutp]  bf16 weight, constant block index -> resident in VMEM
    # b_ref: [1, Coutp]   f32 bias
    # o_ref: [tm, Coutp]  output tile (bf16 inter-layer / f32 heads), lane-dense
    y = jnp.dot(p_ref[...], w_ref[...], preferred_element_type=jnp.float32)
    y = y + b_ref[...]
    if activation == "relu":
        y = jnp.maximum(y, 0.0)
    elif activation == "sigmoid":
        y = jax.nn.sigmoid(y)
    o_ref[...] = y.astype(o_ref.dtype)


# ----------------------------------------------------------------------------
# Parameter preprocessing (runs eagerly, OUTSIDE jit)
# ----------------------------------------------------------------------------
@functools.lru_cache(maxsize=None)
def _patch_perm(kh, kw, cin):
    """Permutation: patch-feature index -> flat (kh, kw, cin) weight index.

    Derived from a concrete integer probe through conv_general_dilated_patches
    (exact in f32/HIGHEST).  Must be called eagerly (outside jit).  Raises if
    the probe does not round-trip to a permutation.
    """
    k = kh * kw * cin
    probe = jnp.arange(k, dtype=jnp.float32).reshape(1, kh, kw, cin)
    pt = jax.lax.conv_general_dilated_patches(
        probe, filter_shape=(kh, kw), window_strides=(1, 1),
        padding=[(0, 0), (0, 0)],
        dimension_numbers=("NHWC", "HWIO", "NHWC"),
        precision=jax.lax.Precision.HIGHEST)
    perm = np.rint(np.asarray(pt)).reshape(-1).astype(np.int64)
    if not np.array_equal(np.sort(perm), np.arange(k)):
        raise RuntimeError(
            "conv_general_dilated_patches probe did not yield a permutation; "
            "cannot determine the patch-feature ordering.")
    return perm


def _pack_weight(w_hwio, b):
    """HWIO conv weight -> (Kp, Coutp) bf16 GEMM weight + (1, Coutp) f32 bias,
    flattened in patch-feature order, zero-padded to Kp % 128 == Coutp % 128 == 0."""
    KH, KW, Cin, Cout = map(int, w_hwio.shape)
    K = KH * KW * Cin
    perm = _patch_perm(KH, KW, Cin)
    Kp, Coutp = _round_up(K, 128), _round_up(Cout, 128)
    w2d = jnp.asarray(w_hwio, jnp.float32).reshape(K, Cout)[perm]
    w2d = jnp.pad(w2d, ((0, Kp - K), (0, Coutp - Cout))).astype(jnp.bfloat16)
    b2d = jnp.pad(jnp.asarray(b, jnp.float32), (0, Coutp - Cout)).reshape(1, Coutp)
    return w2d, b2d


def _torch_conv_to_hwio(w):
    # PyTorch Conv2d weight [cout, cin, kh, kw] -> HWIO [kh, kw, cin, cout]
    return jnp.transpose(w, (2, 3, 1, 0))


def _torch_deconv_to_hwio(w):
    # PyTorch ConvTranspose2d weight [cin, cout, kh, kw] -> HWIO weight of the
    # equivalent stride-1 conv on the s-dilated input: spatial flip + in/out swap.
    return jnp.transpose(jnp.flip(w, axis=(2, 3)), (2, 3, 0, 1))


# ----------------------------------------------------------------------------
# Conv / transposed-conv as (XLA patch extraction) -> fused Pallas GEMM
# ----------------------------------------------------------------------------
def _conv_gemm(x_nhwc, w2d, b2d, *, ksize, cout, strides, padding,
               lhs_dilation=(1, 1), activation="relu", out_dtype=jnp.bfloat16):
    """Conv2d (optionally with input dilation) + bias + activation.

    x_nhwc : [N, H, W, Cin]
    w2d    : [Kp, Coutp]   bf16, pre-permuted/padded (prepare_params)
    b2d    : [1, Coutp]    f32
    """
    N, H, W, Cin = x_nhwc.shape
    KH = KW = ksize
    K = KH * KW * Cin
    Kp, Coutp = w2d.shape
    assert Kp == _round_up(K, 128), (Kp, K)

    # Single fused XLA patch-extraction op, fed to the MXU in bf16.
    patches = jax.lax.conv_general_dilated_patches(
        x_nhwc.astype(jnp.bfloat16),
        filter_shape=(KH, KW),
        window_strides=strides,
        padding=list(padding),
        lhs_dilation=lhs_dilation,
        dimension_numbers=("NHWC", "HWIO", "NHWC"))
    _, Ho, Wo, K_ = patches.shape
    assert K_ == K, (K_, K)
    M = N * Ho * Wo
    p2d = patches.reshape(M, K)

    tm, Mp = _select_tm(M)
    if Mp != M or Kp != K:
        p2d = jnp.pad(p2d, ((0, Mp - M), (0, Kp - K)))

    out2d = pl.pallas_call(
        functools.partial(_gemm_bias_act_kernel, activation=activation),
        out_shape=jax.ShapeDtypeStruct((Mp, Coutp), out_dtype),
        grid_spec=pltpu.PrefetchScalarGridSpec(
            num_scalar_prefetch=0,
            grid=(Mp // tm,),
            in_specs=[
                pl.BlockSpec((tm, Kp), lambda i: (i, 0)),     # patch tile
                pl.BlockSpec((Kp, Coutp), lambda i: (0, 0)),  # resident weight
                pl.BlockSpec((1, Coutp), lambda i: (0, 0)),   # bias
            ],
            out_specs=pl.BlockSpec((tm, Coutp), lambda i: (i, 0)),
        ),
        compiler_params=pltpu.CompilerParams(
            dimension_semantics=("parallel",),
            vmem_limit_bytes=40 * 1024 * 1024),
    )(p2d, w2d, b2d)

    out = out2d[:M, :cout] if (Mp != M or Coutp != cout) else out2d
    return out.reshape(N, Ho, Wo, cout)


# ----------------------------------------------------------------------------
# FlowNet layer table: name -> (cin, cout, ksize, stride, padding, transposed)
# ----------------------------------------------------------------------------
_CONV_LAYERS = {
    "enc1a": (128, 32, 7, 2, 3, False), "enc1b": (32, 32, 7, 1, 3, False),
    "enc2a": (32, 64, 5, 2, 2, False),  "enc2b": (64, 64, 5, 1, 2, False),
    "enc3a": (64, 128, 3, 2, 1, False), "enc3b": (128, 128, 3, 1, 1, False),
    "enc4a": (128, 256, 3, 2, 1, False), "enc4b": (256, 256, 3, 1, 1, False),
    "enc5a": (256, 512, 3, 2, 1, False), "enc5b": (512, 512, 3, 1, 1, False),
    "up5_deconv": (512, 256, 3, 2, 1, True),
    "up4_conv": (512, 256, 3, 1, 1, False), "up4_deconv": (256, 128, 3, 2, 1, True),
    "up3_conv": (256, 128, 3, 1, 1, False), "up3_deconv": (128, 64, 3, 2, 1, True),
    "up2_conv": (128, 64, 3, 1, 1, False),  "up2_deconv": (64, 32, 3, 2, 1, True),
    "up1_conv": (64, 32, 3, 1, 1, False),   "up1_deconv": (32, 32, 3, 2, 1, True),
    "out_conv": (32, 32, 3, 1, 1, False),
    "flow": (32, 2, 3, 1, 1, False),
    "weight": (32, 2, 3, 1, 1, False),
    "head": (32, 4, 3, 1, 1, False),        # fused flow(2) + weight(2) head
}


def init_flownet_params(key):
    """Deterministic synthetic parameters in the native PyTorch layouts:
       Conv2d:          w [cout, cin, k, k];  ConvTranspose2d: w [cin, cout, k, k]."""
    params = {}
    for i, name in enumerate(sorted(n for n in _CONV_LAYERS if n != "head")):
        cin, cout, k, _, _, transposed = _CONV_LAYERS[name]
        kw_, kb_ = jax.random.split(jax.random.fold_in(key, i))
        fan_in = cin * k * k
        shape = (cin, cout, k, k) if transposed else (cout, cin, k, k)
        params[name] = {
            "w": jax.random.normal(kw_, shape, jnp.float32) / np.sqrt(fan_in),
            "b": 0.01 * jax.random.normal(kb_, (cout,), jnp.float32),
        }
    return params


def prepare_params(raw):
    """One-time parameter preprocessing (call OUTSIDE jit): convert PyTorch
    layouts to HWIO, flatten in patch-feature order, pad, cast weights to bf16,
    and fuse the flow/weight heads into one Cout=4 conv."""
    prepared = {}
    for name, p in raw.items():
        if name in ("flow", "weight"):
            continue
        transposed = _CONV_LAYERS[name][5]
        hwio = (_torch_deconv_to_hwio(p["w"]) if transposed
                else _torch_conv_to_hwio(p["w"]))
        w2d, b2d = _pack_weight(hwio, p["b"])
        prepared[name] = {"w": w2d, "b": b2d}
    hwio = jnp.concatenate([_torch_conv_to_hwio(raw["flow"]["w"]),
                            _torch_conv_to_hwio(raw["weight"]["w"])], axis=-1)
    bias = jnp.concatenate([raw["flow"]["b"], raw["weight"]["b"]])
    w2d, b2d = _pack_weight(hwio, bias)
    prepared["head"] = {"w": w2d, "b": b2d}
    return prepared


def _layer(x, params, name, *, activation="relu", out_dtype=jnp.bfloat16,
           output_padding=(1, 1)):
    _, cout, k, stride, pad, transposed = _CONV_LAYERS[name]
    lp = params[name]
    if transposed:
        # ConvTranspose2d(k, stride=s, padding=p, output_padding=op)
        # == stride-1 conv on the s-dilated input, padded (k-1-p, k-1-p+op).
        pads = tuple((k - 1 - pad, k - 1 - pad + op) for op in output_padding)
        return _conv_gemm(x, lp["w"], lp["b"], ksize=k, cout=cout,
                          strides=(1, 1), padding=pads,
                          lhs_dilation=(stride, stride),
                          activation=activation, out_dtype=out_dtype)
    return _conv_gemm(x, lp["w"], lp["b"], ksize=k, cout=cout,
                      strides=(stride, stride),
                      padding=((pad, pad), (pad, pad)), lhs_dilation=(1, 1),
                      activation=activation, out_dtype=out_dtype)


def encoder_forward(x, params):
    """x: NHWC (C=128) -> [x1..x5] NHWC with C = 32/64/128/256/512 (bf16)."""
    x = _layer(x, params, "enc1a")
    x1 = _layer(x, params, "enc1b")
    x = _layer(x1, params, "enc2a")
    x2 = _layer(x, params, "enc2b")
    x = _layer(x2, params, "enc3a")
    x3 = _layer(x, params, "enc3b")
    x = _layer(x3, params, "enc4a")
    x4 = _layer(x, params, "enc4b")
    x = _layer(x4, params, "enc5a")
    x5 = _layer(x, params, "enc5b")
    return [x1, x2, x3, x4, x5]


def decoder_forward(fs, params, *, layer5_output_padding):
    x1, x2, x3, x4, x5 = fs
    x = _layer(x5, params, "up5_deconv", output_padding=layer5_output_padding)
    x = jnp.concatenate([x, x4], axis=-1)
    x = _layer(x, params, "up4_conv")
    x = _layer(x, params, "up4_deconv")
    x = jnp.concatenate([x, x3], axis=-1)
    x = _layer(x, params, "up3_conv")
    x = _layer(x, params, "up3_deconv")
    x = jnp.concatenate([x, x2], axis=-1)
    x = _layer(x, params, "up2_conv")
    x = _layer(x, params, "up2_deconv")
    x = jnp.concatenate([x, x1], axis=-1)
    x = _layer(x, params, "up1_conv")
    x = _layer(x, params, "up1_deconv")
    x = _layer(x, params, "out_conv")
    # Fused heads (Cout=4, f32): channels 0:2 = flow, 2:4 = sigmoid(weight).
    y = _layer(x, params, "head", activation="none", out_dtype=jnp.float32)
    flow = y[..., 0:2]
    weight = jax.nn.sigmoid(y[..., 2:4])
    return flow, weight


@functools.partial(jax.jit, static_argnames=("feat_size",))
def flownet_forward(f1, f2, params, *, feat_size):
    """FlowNet.forward: f1, f2: [b, f, c, h, w] -> (flow, weight): [b, f, h, w, 2]."""
    x = jnp.concatenate([f1, f2], axis=-3)               # channels: 2c = 128
    b, f, c, h, w = x.shape
    x = x.reshape(b * f, c, h, w)                        # 'b f c h w -> (b f) c h w'
    x = jnp.transpose(x, (0, 2, 3, 1)).astype(jnp.bfloat16)   # NCHW -> NHWC bf16
    fs = encoder_forward(x, params)
    op5 = (1, 1) if feat_size % (2 ** 5) == 0 else (0, 0)
    flow, weight = decoder_forward(fs, params, layer5_output_padding=op5)
    flow = flow.reshape(b, f, *flow.shape[1:])           # '(b f) h w c -> b f h w c'
    weight = weight.reshape(b, f, *weight.shape[1:])
    return flow, weight


# ----------------------------------------------------------------------------
# Reference (pure XLA) conv for an exact numerical self-check of the kernel
# ----------------------------------------------------------------------------
def _reference_conv(x, w_hwio, b, *, strides, padding, lhs_dilation, activation):
    y = jax.lax.conv_general_dilated(
        x, w_hwio, window_strides=strides, padding=list(padding),
        lhs_dilation=lhs_dilation,
        dimension_numbers=("NHWC", "HWIO", "NHWC"),
        precision=jax.lax.Precision.HIGHEST)
    y = y + b.reshape(1, 1, 1, -1)
    if activation == "relu":
        y = jnp.maximum(y, 0.0)
    elif activation == "sigmoid":
        y = jax.nn.sigmoid(y)
    return y


if __name__ == "__main__":
    key = jax.random.PRNGKey(0)
    k_f1, k_f2, k_par, k_chk = jax.random.split(key, 4)

    # --- exact self-check: fused Pallas conv-GEMM vs. XLA reference ----------
    # Integer-valued data is exact in bf16 and the MXU accumulates in f32, so
    # the kernel must match the f32 reference exactly; any weight-permutation
    # or padding bug shows up loudly here (addresses the review's tight check).
    kx, kwt, kbt = jax.random.split(k_chk, 3)
    xt = jax.random.randint(kx, (2, 9, 9, 16), -4, 5).astype(jnp.float32)
    wt = jax.random.randint(kwt, (5, 5, 16, 32), -3, 4).astype(jnp.float32)
    bt = jax.random.randint(kbt, (32,), -8, 9).astype(jnp.float32)
    w2d_t, b2d_t = _pack_weight(wt, bt)
    for strides, padding, dil, act in [
        ((2, 2), ((2, 2), (2, 2)), (1, 1), "relu"),      # strided conv
        ((1, 1), ((1, 2), (1, 2)), (2, 2), "none"),      # transposed-conv form
        ((1, 1), ((2, 2), (2, 2)), (1, 1), "sigmoid"),   # sigmoid head form
    ]:
        got = _conv_gemm(xt, w2d_t, b2d_t, ksize=5, cout=32, strides=strides,
                         padding=padding, lhs_dilation=dil, activation=act,
                         out_dtype=jnp.float32)
        ref = _reference_conv(xt, wt, bt, strides=strides, padding=padding,
                              lhs_dilation=dil, activation=act)
        assert got.shape == ref.shape, (got.shape, ref.shape)
        np.testing.assert_allclose(np.asarray(got), np.asarray(ref),
                                   atol=1e-4, rtol=0)

    # --- full FlowNet forward -------------------------------------------------
    # f1, f2: [b, f, c, h, w]; encoder input channels after concat = 2c = 128.
    b, f, c, h, w = 1, 2, 64, 16, 16
    f1 = jax.random.normal(k_f1, (b, f, c, h, w), jnp.float32)
    f2 = jax.random.normal(k_f2, (b, f, c, h, w), jnp.float32)
    params = prepare_params(init_flownet_params(k_par))   # eager, outside jit

    flow, weight = flownet_forward(f1, f2, params, feat_size=h)
    flow, weight = jax.block_until_ready((flow, weight))

    assert flow.shape == (b, f, h, w, 2), flow.shape
    assert weight.shape == (b, f, h, w, 2), weight.shape
    assert bool(jnp.all(jnp.isfinite(flow)))
    assert bool(jnp.all(jnp.isfinite(weight)))
    assert bool(jnp.all((weight >= 0.0) & (weight <= 1.0)))   # sigmoid head

    print("KERNEL_OK")
</pallas_src>

<mosaic_0001>
module attributes {stable_mosaic.version = 11 : i64} {
  func.func @_gemm_bias_act_kernel(%arg0: i32, %arg1: memref<64x512xbf16, #tpu.memory_space<vmem>>, %arg2: memref<512x128xbf16, #tpu.memory_space<vmem>>, %arg3: memref<1x128xf32, #tpu.memory_space<vmem>>, %arg4: memref<64x128xf32, #tpu.memory_space<vmem>>) attributes {dimension_semantics = [#tpu.dimension_semantics<parallel>], iteration_bounds = array<i64: 1>, scalar_prefetch = 0 : i64, scratch_operands = 0 : i64, tpu.core_type = #tpu.core_type<tc>, window_params = [{transform_indices = @transform_0, window_bounds = array<i64: 64, 512>}, {pipeline_mode = #tpu.pipeline_mode<synchronous>, transform_indices = @transform_1, window_bounds = array<i64: 512, 128>}, {pipeline_mode = #tpu.pipeline_mode<synchronous>, transform_indices = @transform_2, window_bounds = array<i64: 1, 128>}, {transform_indices = @transform_3, window_bounds = array<i64: 64, 128>}]} {
    %c0 = arith.constant 0 : index
    %c0_0 = arith.constant 0 : index
    %0 = vector.load %arg1[%c0, %c0_0] : memref<64x512xbf16, #tpu.memory_space<vmem>>, vector<64x512xbf16>
    %c0_1 = arith.constant 0 : index
    %c0_2 = arith.constant 0 : index
    %1 = vector.load %arg2[%c0_1, %c0_2] : memref<512x128xbf16, #tpu.memory_space<vmem>>, vector<512x128xbf16>
    %cst = arith.constant dense<0.000000e+00> : vector<64x128xf32>
    %2 = tpu.matmul %0, %1, %cst {dimension_numbers = #tpu.dot_dimension_numbers<[1], [0], [0], [1], [0, 0, 1, 1], [], []>} : vector<64x512xbf16>, vector<512x128xbf16>, vector<64x128xf32> -> vector<64x128xf32>
    %c0_3 = arith.constant 0 : index
    %c0_4 = arith.constant 0 : index
    %3 = vector.load %arg3[%c0_3, %c0_4] : memref<1x128xf32, #tpu.memory_space<vmem>>, vector<1x128xf32>
    %4 = vector.broadcast %3 : vector<1x128xf32> to vector<64x128xf32>
    %5 = arith.addf %2, %4 : vector<64x128xf32>
    %cst_5 = arith.constant 0.000000e+00 : f32
    %6 = vector.broadcast %cst_5 : f32 to vector<64x128xf32>
    %7 = arith.maximumf %5, %6 : vector<64x128xf32>
    %c0_6 = arith.constant 0 : index
    %c0_7 = arith.constant 0 : index
    %8 = vector.load %arg4[%c0_6, %c0_7] : memref<64x128xf32, #tpu.memory_space<vmem>>, vector<64x128xf32>
    tpu.vector_store %arg4[%c0_6, %c0_7], %7 {strides = array<i32>} : memref<64x128xf32, #tpu.memory_space<vmem>>, vector<64x128xf32>,
    return
  }
  func.func @transform_0(%arg0: i32) -> (i32, i32) {
    %c0_i32 = arith.constant 0 : i32
    %c0_i32_0 = arith.constant 0 : i32
    return %arg0, %c0_i32 : i32, i32
  }
  func.func @transform_1(%arg0: i32) -> (i32, i32) {
    %c0_i32 = arith.constant 0 : i32
    %c0_i32_0 = arith.constant 0 : i32
    %c0_i32_1 = arith.constant 0 : i32
    return %c0_i32, %c0_i32_0 : i32, i32
  }
  func.func @transform_2(%arg0: i32) -> (i32, i32) {
    %c0_i32 = arith.constant 0 : i32
    %c0_i32_0 = arith.constant 0 : i32
    %c0_i32_1 = arith.constant 0 : i32
    return %c0_i32, %c0_i32_0 : i32, i32
  }
  func.func @transform_3(%arg0: i32) -> (i32, i32) {
    %c0_i32 = arith.constant 0 : i32
    %c0_i32_0 = arith.constant 0 : i32
    return %arg0, %c0_i32 : i32, i32
  }
}

</mosaic_0001>

<bundles_post_ra>
// kernel: tpu_custom_call.1
= control target key start
LH: loop header
LB: loop body
LE: loop exit
PB: predicated region body
PF: predicated region fallthrough
CT: control target
= control target key end

     0   :  { %8 = vsyncpa [#allocation3], 0  ;;  %s878_s0 = inlined_call_operand.hbm [shape: bf16[64,512], index: 0, kind: input, shape index: {}]   ;;  %s879_s1 = inlined_call_operand.hbm [shape: bf16[512,128], index: 1, kind: input, shape index: {}]   ;;  %s880_s2 = inlined_call_operand.vmem [shape: f32[1,128], index: 2, kind: input, shape index: {}]   ;;  %s881_s3 = inlined_call_operand.hbm [shape: f32[64,128], index: 3, kind: output, shape index: {}]  }
   0x1   :  { %9 = vsyncpa [#allocation6], 0 }
   0x2   :  { %10 = vsyncpa [#allocation4], 0  ;;  %s827_s12 = smov [#allocation2]  }
   0x3   :  { %s16_s13 = sshll.u32 %s827_s12, 4  ;;  %s17_s13 = int_to_ptr.vmem [resolvable:$true] %s16_s13 }
   0x4   :  { %s769_s14 = scalar_lea.vmem %s17_s13, 2048  ;;  %p774_p1 = scmp.lt.s32.totalorder %s17_s13, %s17_s13 }
   0x5   :  { %p770_p0 = scmp.ne.s32.totalorder %s17_s13, %s769_s14  ;;  %p775_p2 = scmp.lt.s32.totalorder %s769_s14, %s769_s14 }
   0x7   :  { %p776_p3 = por %p775_p2, %p774_p1 }
   0x9   :  { %p777_p4 = pnand %p776_p3, %p770_p0 }
   0xb   :  { %780 = shalt.err (!%p777_p4)
}
   0xc   :  { %s828_s15 = smov 256   ;;  %s829_s16 = smov 16  }
   0xd   :  { %22 = dma.hbm_to_vmem [thread:$0]  %s878_s0, 2048, %s17_s13, [#allocation3], %s828_s15, %s828_s15, %s829_s16  }
   0xe   :  { %s830_s19 = smov [#allocation5]  }
   0xf   :  { %s28_s20 = sshll.u32 %s830_s19, 4  ;;  %s29_s20 = int_to_ptr.vmem [resolvable:$true] %s28_s20 }
  0x10   :  { %s789_s21 = scalar_lea.vmem %s29_s20, 4096  ;;  %p794_p6 = scmp.lt.s32.totalorder %s29_s20, %s29_s20 }
  0x11   :  { %p790_p5 = scmp.ne.s32.totalorder %s29_s20, %s789_s21  ;;  %p795_p7 = scmp.lt.s32.totalorder %s789_s21, %s789_s21 }
  0x13   :  { %p796_p8 = por %p795_p7, %p794_p6 }
  0x15   :  { %p797_p9 = pnand %p796_p8, %p790_p5 }
  0x17   :  { %800 = shalt.err (!%p797_p9)
}
  0x18   :  { %s831_s22 = smov 64   ;;  %s832_s23 = smov 4  }
  0x19   :  { %34 = dma.hbm_to_vmem [thread:$0]  %s879_s1, 4096, %s29_s20, [#allocation6], %s831_s22, %s831_s22, %s832_s23  }
  0x1a   :  { %821 = dma.done.wait [#allocation3], 2048  }
  0x1b   :  { %822 = vsyncadd [#allocation3], 4294965248 }
  0x1c   :  { %823 = dma.done.wait [#allocation6], 4096  }
  0x1d   :  { %824 = vsyncadd [#allocation6], 4294963200  ;;  %v705_v0 = vld [vmem:[#allocation5 + $0x78] sm:$0xff]   ;;  %v709_v4 = vld [vmem:[#allocation5 + $0x70] sm:$0xff]  }
  0x1e   :  { %v706_v1 = vld [vmem:[#allocation5 + $0xf8] sm:$0xff]   ;;  %616 = vmatprep.subr.bf16.mxu0 %v705_v0  ;;  %v710_v5 = vld [vmem:[#allocation5 + $0xf0] sm:$0xff]   ;;  %v713_v8 = vld [vmem:[#allocation5 + $0x68] sm:$0xff]  }
  0x1f   :  { %v707_v2 = vld [vmem:[#allocation5 + $0x38] sm:$0xff]   ;;  %656 = vmatprep.subr.bf16.mxu1 %v706_v1  ;;  %v711_v6 = vld [vmem:[#allocation5 + $0x30] sm:$0xff]   ;;  %v714_v9 = vld [vmem:[#allocation5 + $0xe8] sm:$0xff]  }
  0x20   :  { %v708_v3 = vld [vmem:[#allocation5 + $0xb8] sm:$0xff]   ;;  %617 = vmatpush3.bf16.msra.mxu0 %v707_v2  ;;  %v712_v7 = vld [vmem:[#allocation5 + $0xb0] sm:$0xff]   ;;  %v715_v10 = vld [vmem:[#allocation5 + $0x28] sm:$0xff]  }
  0x21   :  { %657 = vmatpush3.bf16.msra.mxu1 %v708_v3  ;;  %618 = vmatprep.subr.bf16.mxu0 %v709_v4  ;;  %v716_v11 = vld [vmem:[#allocation5 + $0xa8] sm:$0xff]   ;;  %v717_v12 = vld [vmem:[#allocation5 + $0x60] sm:$0xff]   ;;  %v721_v16 = vld [vmem:[#allocation5 + $0x58] sm:$0xff]  }
  0x22   :  { %658 = vmatprep.subr.bf16.mxu1 %v710_v5  ;;  %v718_v13 = vld [vmem:[#allocation5 + $0xe0] sm:$0xff]   ;;  %v722_v17 = vld [vmem:[#allocation5 + $0xd8] sm:$0xff]   ;;  %v725_v20 = vld [vmem:[#allocation5 + $0x50] sm:$0xff]  }
  0x23   :  { %v719_v14 = vld [vmem:[#allocation5 + $0x20] sm:$0xff]   ;;  %v723_v18 = vld [vmem:[#allocation5 + $0x18] sm:$0xff]   ;;  %v726_v21 = vld [vmem:[#allocation5 + $0xd0] sm:$0xff]  }
  0x24   :  { %619 = vmatpush3.bf16.msra.mxu0 %v711_v6  ;;  %v720_v15 = vld [vmem:[#allocation5 + $0xa0] sm:$0xff]   ;;  %v724_v19 = vld [vmem:[#allocation5 + $0x98] sm:$0xff]   ;;  %v727_v22 = vld [vmem:[#allocation5 + $0x10] sm:$0xff]  }
  0x25   :  { %659 = vmatpush3.bf16.msra.mxu1 %v712_v7  ;;  %620 = vmatprep.subr.bf16.mxu0 %v713_v8  ;;  %v728_v23 = vld [vmem:[#allocation5 + $0x90] sm:$0xff]   ;;  %v729_v24 = vld [vmem:[#allocation5 + $0x48] sm:$0xff]   ;;  %v733_v28 = vld [vmem:[#allocation5 + $0x40] sm:$0xff]  }
  0x26   :  { %660 = vmatprep.subr.bf16.mxu1 %v714_v9  ;;  %v730_v25 = vld [vmem:[#allocation5 + $0xc8] sm:$0xff]   ;;  %v734_v29 = vld [vmem:[#allocation5 + $0xc0] sm:$0xff]  }
  0x27   :  { %v731_v26 = vld [vmem:[#allocation5 + $0x8] sm:$0xff]   ;;  %v735_v30 = vld [vmem:[#allocation5] sm:$0xff]  }
  0x28   :  { %621 = vmatpush3.bf16.msra.mxu0 %v715_v10  ;;  %v732_v27 = vld [vmem:[#allocation5 + $0x88] sm:$0xff]   ;;  %v736_v31 = vld [vmem:[#allocation5 + $0x80] sm:$0xff]  }
  0x29   :  { %661 = vmatpush3.bf16.msra.mxu1 %v716_v11  ;;  %622 = vmatprep.subr.bf16.mxu0 %v717_v12  ;;  %v737_v32 = vld [vmem:[#allocation2] ss:$16 sps:$4 sm:$0xff]   ;;  %v739_v33 = vld [vmem:[#allocation2 + $0x4] ss:$16 sps:$4 sm:$0xff]   ;;  %v740_v34 = vld [vmem:[#allocation2 + $0x8] ss:$16 sps:$4 sm:$0xff]  }
  0x2a   :  { %662 = vmatprep.subr.bf16.mxu1 %v718_v13  ;;  %v742_v35 = vld [vmem:[#allocation2 + $0xc] ss:$16 sps:$4 sm:$0xff]   ;;  %435 = vmatprep.mubr.bf16.mxu0 %v739_v33  ;;  %v743_v36 = vld [vmem:[#allocation2 + $0x24] ss:$16 sps:$4 sm:$0xff]   ;;  %v747_v38 = vld [vmem:[#allocation2 + $0x20] ss:$16 sps:$4 sm:$0xff]  }
  0x2b   :  { %500 = vmatprep.mubr.bf16.mxu1 %v742_v35  ;;  %v745_v37 = vld [vmem:[#allocation2 + $0x2c] ss:$16 sps:$4 sm:$0xff]   ;;  %v748_v39 = vld [vmem:[#allocation2 + $0x28] ss:$16 sps:$4 sm:$0xff]   ;;  %v749_v40 = vld [vmem:[#allocation2 + $0x44] ss:$16 sps:$4 sm:$0xff]  }
  0x2c   :  { %623 = vmatpush3.bf16.msra.mxu0 %v719_v14  ;;  %v751_v41 = vld [vmem:[#allocation2 + $0x4c] ss:$16 sps:$4 sm:$0xff]   ;;  %v753_v42 = vld [vmem:[#allocation2 + $0x40] ss:$16 sps:$4 sm:$0xff]   ;;  %v754_v43 = vld [vmem:[#allocation2 + $0x48] ss:$16 sps:$4 sm:$0xff]  }
  0x2d   :  { %663 = vmatpush3.bf16.msra.mxu1 %v720_v15  ;;  %624 = vmatprep.subr.bf16.mxu0 %v721_v16  ;;  %v755_v44 = vld [vmem:[#allocation2 + $0x64] ss:$16 sps:$4 sm:$0xff]   ;;  %v757_v45 = vld [vmem:[#allocation2 + $0x6c] ss:$16 sps:$4 sm:$0xff]   ;;  %v759_v46 = vld [vmem:[#allocation2 + $0x60] ss:$16 sps:$4 sm:$0xff]  }
  0x2e   :  { %664 = vmatprep.subr.bf16.mxu1 %v722_v17  ;;  %v760_v47 = vld [vmem:[#allocation2 + $0x68] ss:$16 sps:$4 sm:$0xff]   ;;  %v865_v50 = vld [vmem:[%s880_s2] ss:$0 sm:$0xff]  ;;  %s833_s2 = smov [#allocation7]  }
  0x2f   :  { %s554_s26 = sshll.u32 %s833_s2, 4  ;;  %s555_s26 = int_to_ptr.vmem [resolvable:$true] %s554_s26 }
  0x30   :  { %625 = vmatpush3.bf16.msra.mxu0 %v723_v18  ;;  %s801_s27 = scalar_lea.vmem %s555_s26, 1024  ;;  %p806_p11 = scmp.lt.s32.totalorder %s555_s26, %s555_s26 }
  0x31   :  { %665 = vmatpush3.bf16.msra.mxu1 %v724_v19  ;;  %626 = vmatprep.subr.bf16.mxu0 %v725_v20  ;;  %p802_p10 = scmp.ne.s32.totalorder %s555_s26, %s801_s27  ;;  %p807_p12 = scmp.lt.s32.totalorder %s801_s27, %s801_s27 }
  0x32   :  { %666 = vmatprep.subr.bf16.mxu1 %v726_v21 }
  0x33   :  { %p808_p13 = por %p807_p12, %p806_p11 }
  0x34   :  { %627 = vmatpush3.bf16.msra.mxu0 %v727_v22 }
  0x35   :  { %667 = vmatpush3.bf16.msra.mxu1 %v728_v23  ;;  %628 = vmatprep.subr.bf16.mxu0 %v729_v24  ;;  %p809_p0 = pnand %p808_p13, %p802_p10 }
  0x36   :  { %668 = vmatprep.subr.bf16.mxu1 %v730_v25 }
  0x38   :  { %629 = vmatpush3.bf16.msra.mxu0 %v731_v26 }
  0x39   :  { %669 = vmatpush3.bf16.msra.mxu1 %v732_v27  ;;  %630 = vmatprep.subr.bf16.mxu0 %v733_v28 }
  0x3a   :  { %670 = vmatprep.subr.bf16.mxu1 %v734_v29 }
  0x3c   :  { %631 = vmatpush3.bf16.msra.mxu0 %v735_v30 }
  0x3d   :  { %671 = vmatpush3.bf16.msra.mxu1 %v736_v31 }
  0x3f   :  { %436 = vmatmul.mubr.bf16.vlgmr.msra.gmra.mxu0 %v737_v32 }
  0x40   :  { %501 = vmatmul.mubr.bf16.vlgmr.msra.gmra.mxu1 %v740_v34  ;;  %443 = vmatprep.mubr.bf16.mxu0 %v743_v36 }
  0x41   :  { %508 = vmatprep.mubr.bf16.mxu1 %v745_v37 }
  0x47   :  { %444 = vmatmul.mubr.bf16.gmra.mxu0 %v747_v38 }
  0x48   :  { %509 = vmatmul.mubr.bf16.gmra.mxu1 %v748_v39  ;;  %451 = vmatprep.mubr.bf16.mxu0 %v749_v40 }
  0x49   :  { %516 = vmatprep.mubr.bf16.mxu1 %v751_v41 }
  0x4f   :  { %452 = vmatmul.mubr.bf16.gmra.mxu0 %v753_v42 }
  0x50   :  { %517 = vmatmul.mubr.bf16.gmra.mxu1 %v754_v43  ;;  %459 = vmatprep.mubr.bf16.mxu0 %v755_v44 }
  0x51   :  { %524 = vmatprep.mubr.bf16.mxu1 %v757_v45 }
  0x57   :  { %460 = vmatmul.mubr.bf16.gmra.mxu0 %v759_v46 }
  0x58   :  { %525 = vmatmul.mubr.bf16.gmra.mxu1 %v760_v47 }
  0xff   :  { %v632_v48 = vpop.f32.mrf.mxu0 }
 0x100   :  { %v672_v49 = vpop.f32.mrf.mxu1 }
 0x101   :  { %v633_v51 = vpop.f32.mrf.mxu0 }
 0x102   :  { %v634_v52 = vadd.f32 %v633_v51, %v632_v48  ;;  %v673_v53 = vpop.f32.mrf.mxu1 }
 0x103   :  { %v635_v54 = vpop.f32.mrf.mxu0  ;;  %v674_v56 = vadd.f32 %v673_v53, %v672_v49 }
 0x104   :  { %v438_v55 = vadd.f32 %v634_v52, %v865_v50  ;;  %v675_v57 = vpop.f32.mrf.mxu1 }
 0x105   :  { %v636_v58 = vpop.f32.mrf.mxu0 }
 0x106   :  { %v503_v59 = vadd.f32 %v674_v56, %v438_v55  ;;  %v637_v60 = vadd.f32 %v636_v58, %v635_v54  ;;  %v676_v61 = vpop.f32.mrf.mxu1 }
 0x107   :  { %v638_v62 = vpop.f32.mrf.mxu0  ;;  %v677_v1 = vadd.f32 %v676_v61, %v675_v57 }
 0x108   :  { %v533_v63 = vmax.f32 %v503_v59, 0.0  ;;  %v441_v0 = vadd.f32 %v637_v60, %v865_v50  ;;  %v678_v2 = vpop.f32.mrf.mxu1 }
 0x109   :  { %v639_v3 = vpop.f32.mrf.mxu0 }
 0x10a   :  { %541 = vst [vmem:[#allocation7] sm:$0xff] %v533_v63  ;;  %v506_v4 = vadd.f32 %v677_v1, %v441_v0  ;;  %v640_v5 = vadd.f32 %v639_v3, %v638_v62  ;;  %v679_v6 = vpop.f32.mrf.mxu1 }
 0x10b   :  { %v641_v7 = vpop.f32.mrf.mxu0  ;;  %v680_v10 = vadd.f32 %v679_v6, %v678_v2 }
 0x10c   :  { %v534_v8 = vmax.f32 %v506_v4, 0.0  ;;  %v446_v9 = vadd.f32 %v640_v5, %v865_v50  ;;  %v681_v11 = vpop.f32.mrf.mxu1 }
 0x10d   :  { %v642_v12 = vpop.f32.mrf.mxu0 }
 0x10e   :  { %542 = vst [vmem:[#allocation7 + $0x8] sm:$0xff] %v534_v8  ;;  %v511_v13 = vadd.f32 %v680_v10, %v446_v9  ;;  %v643_v14 = vadd.f32 %v642_v12, %v641_v7  ;;  %v682_v15 = vpop.f32.mrf.mxu1 }
 0x10f   :  { %v644_v16 = vpop.f32.mrf.mxu0  ;;  %v683_v19 = vadd.f32 %v682_v15, %v681_v11 }
 0x110   :  { %v535_v17 = vmax.f32 %v511_v13, 0.0  ;;  %v449_v18 = vadd.f32 %v643_v14, %v865_v50  ;;  %v684_v20 = vpop.f32.mrf.mxu1 }
 0x111   :  { %v645_v21 = vpop.f32.mrf.mxu0 }
 0x112   :  { %543 = vst [vmem:[#allocation7 + $0x10] sm:$0xff] %v535_v17  ;;  %v514_v22 = vadd.f32 %v683_v19, %v449_v18  ;;  %v646_v23 = vadd.f32 %v645_v21, %v644_v16  ;;  %v685_v24 = vpop.f32.mrf.mxu1 }
 0x113   :  { %v647_v25 = vpop.f32.mrf.mxu0  ;;  %v686_v28 = vadd.f32 %v685_v24, %v684_v20 }
 0x114   :  { %v536_v26 = vmax.f32 %v514_v22, 0.0  ;;  %v454_v27 = vadd.f32 %v646_v23, %v865_v50  ;;  %v687_v29 = vpop.f32.mrf.mxu1 }
 0x115   :  { %v648_v30 = vpop.f32.mrf.mxu0 }
 0x116   :  { %544 = vst [vmem:[#allocation7 + $0x18] sm:$0xff] %v536_v26  ;;  %v519_v31 = vadd.f32 %v686_v28, %v454_v27  ;;  %v649_v32 = vadd.f32 %v648_v30, %v647_v25  ;;  %v688_v33 = vpop.f32.mrf.mxu1 }
 0x117   :  { %v650_v34 = vpop.f32.mrf.mxu0  ;;  %v689_v37 = vadd.f32 %v688_v33, %v687_v29 }
 0x118   :  { %v537_v35 = vmax.f32 %v519_v31, 0.0  ;;  %v457_v36 = vadd.f32 %v649_v32, %v865_v50  ;;  %v690_v38 = vpop.f32.mrf.mxu1 }
 0x119   :  { %v651_v39 = vpop.f32.mrf.mxu0 }
 0x11a   :  { %545 = vst [vmem:[#allocation7 + $0x20] sm:$0xff] %v537_v35  ;;  %v522_v40 = vadd.f32 %v689_v37, %v457_v36  ;;  %v652_v41 = vadd.f32 %v651_v39, %v650_v34  ;;  %v691_v42 = vpop.f32.mrf.mxu1 }
 0x11b   :  { %v653_v43 = vpop.f32.mrf.mxu0  ;;  %v692_v46 = vadd.f32 %v691_v42, %v690_v38 }
 0x11c   :  { %v538_v44 = vmax.f32 %v522_v40, 0.0  ;;  %v462_v45 = vadd.f32 %v652_v41, %v865_v50  ;;  %v693_v47 = vpop.f32.mrf.mxu1 }
 0x11d   :  { %v654_v48 = vpop.f32.mrf.mxu0 }
 0x11e   :  { %546 = vst [vmem:[#allocation7 + $0x28] sm:$0xff] %v538_v44  ;;  %v527_v49 = vadd.f32 %v692_v46, %v462_v45  ;;  %v655_v51 = vadd.f32 %v654_v48, %v653_v43  ;;  %v694_v52 = vpop.f32.mrf.mxu1 }
 0x11f   :  { %v695_v55 = vadd.f32 %v694_v52, %v693_v47 }
 0x120   :  { %v539_v53 = vmax.f32 %v527_v49, 0.0  ;;  %v465_v54 = vadd.f32 %v655_v51, %v865_v50 }
 0x122   :  { %547 = vst [vmem:[#allocation7 + $0x30] sm:$0xff] %v539_v53  ;;  %v530_v56 = vadd.f32 %v695_v55, %v465_v54 }
 0x124   :  { %v540_v57 = vmax.f32 %v530_v56, 0.0 }
 0x126   :  { %548 = vst [vmem:[#allocation7 + $0x38] sm:$0xff] %v540_v57 }
 0x127   :  { %812 = shalt.err (!%p809_p0)
}
 0x128   :  { %s834_s28 = smov 128   ;;  %s835_s29 = smov 8  }
 0x129   :  { %560 = dma.vmem_to_hbm [thread:$0]  %s555_s26, 1024, %s881_s3, [#allocation4], %s834_s28, %s834_s28, %s835_s29  }
 0x12a   :  { %825 = dma.done.wait [#allocation4], 1024  }
 0x12b   :  { %826 = vsyncadd [#allocation4], 4294966272 }
 0x12c   :  { %564 = vsyncpa [#allocation3], 1 }
 0x12d   :  { %565 = vsyncpa [#allocation6], 1 }
 0x12e   :  { %566 = vsyncpa [#allocation4], 1 }

</bundles_post_ra>
